<compile_context>
chip_gen: v6e
topology: v6e:2x2x1
jax: 0.10.0
libtpu: 0.0.40
codegen_flags: <defaults>
</compile_context>

<pallas_src>
import jax
import jax.numpy as jnp
from jax.experimental import pallas as pl
from jax.experimental.pallas import tpu as pltpu

LANE = 128              # TPU lane width
DEFAULT_BLOCK_B = 2048  # batch tile (multiple of 8); ~86% of HBM roofline per
                        # measured tiled mem-bound kernels, still tiny in VMEM.


def _round_up(n, m):
    return (n + m - 1) // m * m


def mlp_kernel(x_ref, w1_ref, b1_ref, w2_ref, b2_ref, w3_ref, b3_ref, o_ref):
    # One batch tile per grid step; three MXU matmuls with f32 accumulation.
    x = x_ref[...]
    h1 = jnp.dot(x, w1_ref[...], preferred_element_type=jnp.float32) + b1_ref[...]
    h1 = jnp.maximum(h1, 0.0)
    h2 = jnp.dot(h1, w2_ref[...], preferred_element_type=jnp.float32) + b2_ref[...]
    h2 = jnp.maximum(h2, 0.0)
    # Final matmul is lane-narrow (N = num_out): the masked store is hidden
    # under the (dominant) output DMA, and it keeps HBM writeback minimal.
    out = jnp.dot(h2, w3_ref[...], preferred_element_type=jnp.float32) + b3_ref[...]
    o_ref[...] = out.astype(o_ref.dtype)


def init_params(key, num_in, num_out):
    """Deterministic init, PyTorch Linear weight layout (out_features, in_features)."""
    ks = jax.random.split(key, 6)

    def lin(kw, kb, fan_in, fan_out):
        bound = 1.0 / jnp.sqrt(fan_in)
        W = jax.random.uniform(kw, (fan_out, fan_in), jnp.float32, -bound, bound)
        b = jax.random.uniform(kb, (fan_out,), jnp.float32, -bound, bound)
        return W, b

    W1, b1 = lin(ks[0], ks[1], num_in, 30)
    W2, b2 = lin(ks[2], ks[3], 30, 20)
    W3, b3 = lin(ks[4], ks[5], 20, num_out)
    return {"W1": W1, "b1": b1, "W2": W2, "b2": b2, "W3": W3, "b3": b3}


def prepare_params(params):
    """One-time (load-time) conversion to kernel-ready layout.

    Weights are transposed to (in, out); the two hidden feature dims are
    zero-padded up to one 128-lane vreg.  The final layer keeps its narrow
    num_out width (only its contraction rows are padded), so the kernel's
    output is exactly (B, num_out).  Zero padding is numerically transparent:
    padded weight rows/cols and padded bias entries are zero and ReLU(0)=0.
    """
    W1, b1 = params["W1"], params["b1"]
    W2, b2 = params["W2"], params["b2"]
    W3, b3 = params["W3"], params["b3"]
    num_in = W1.shape[1]
    h1, h2, num_out = W1.shape[0], W2.shape[0], W3.shape[0]
    H1P = _round_up(h1, LANE)
    H2P = _round_up(h2, LANE)

    def pad2(a, rows, cols):
        z = jnp.zeros((rows, cols), a.dtype)
        return z.at[: a.shape[0], : a.shape[1]].set(a)

    return {
        "w1": pad2(W1.T, num_in, H1P),           # (num_in, 128)
        "b1": pad2(b1.reshape(1, -1), 1, H1P),   # (1, 128)
        "w2": pad2(W2.T, H1P, H2P),              # (128, 128)
        "b2": pad2(b2.reshape(1, -1), 1, H2P),   # (1, 128)
        "w3": pad2(W3.T, H2P, num_out),          # (128, num_out) — lane-narrow
        "b3": b3.reshape(1, -1),                 # (1, num_out)
        "num_out": int(num_out),
    }


def neural_network_forward(x, prep, *, block_batch=DEFAULT_BLOCK_B, out_dtype=None):
    """x: (B, num_in) float32.  prep: output of prepare_params (kernel-ready).

    out_dtype: optional narrower output dtype (e.g. jnp.bfloat16) to halve the
    dominant output writeback stream; accumulation stays f32 in-kernel.
    """
    B, num_in = x.shape
    w1, b1 = prep["w1"], prep["b1"]
    w2, b2 = prep["w2"], prep["b2"]
    w3, b3 = prep["w3"], prep["b3"]
    num_out = prep["num_out"]
    H1P, H2P = w1.shape[1], w2.shape[1]
    out_dtype = x.dtype if out_dtype is None else out_dtype

    # Batch tile selection:
    #  * tiny batches: one full-batch step (launch-overhead bound anyway);
    #  * otherwise: at least 2 grid steps so the "parallel" axis shards across
    #    v7x's two TensorCores, capped at block_batch, kept a multiple of 8.
    if B < 16:
        TB = B
    else:
        TB = min(block_batch, _round_up(pl.cdiv(B, 2), 8))
    grid = (pl.cdiv(B, TB),)

    def const_spec(shape):
        # Constant block index -> fetched once, stays VMEM-resident across steps.
        return pl.BlockSpec(shape, lambda i: (0, 0))

    out = pl.pallas_call(
        mlp_kernel,
        out_shape=jax.ShapeDtypeStruct((B, num_out), out_dtype),  # lane-narrow
        grid=grid,
        in_specs=[
            pl.BlockSpec((TB, num_in), lambda i: (i, 0)),   # batch-tiled input
            const_spec((num_in, H1P)), const_spec((1, H1P)),
            const_spec((H1P, H2P)), const_spec((1, H2P)),
            const_spec((H2P, num_out)), const_spec((1, num_out)),
        ],
        # Block last dim == full array dim (num_out), so the narrow block is legal.
        out_specs=pl.BlockSpec((TB, num_out), lambda i: (i, 0)),
        compiler_params=pltpu.CompilerParams(
            dimension_semantics=("parallel",),       # shard batch across TCs (v7x)
            vmem_limit_bytes=32 * 1024 * 1024,       # above v5e's 16 MiB default
        ),
    )(x, w1, b1, w2, b2, w3, b3)
    return out


def reference_forward(x, p):
    h1 = jnp.maximum(x @ p["W1"].T + p["b1"], 0.0)
    h2 = jnp.maximum(h1 @ p["W2"].T + p["b2"], 0.0)
    return h2 @ p["W3"].T + p["b3"]


if __name__ == "__main__":
    num_in, num_out = 4, 3
    key = jax.random.PRNGKey(0)
    kx, kp, kx2 = jax.random.split(key, 3)
    params = init_params(kp, num_in, num_out)

    # One-time parameter prep (NOT in the per-call forward path).
    prep = prepare_params(params)

    # 1) Tiny-batch path: single grid step (B=8).
    x = jax.random.normal(kx, (8, num_in), jnp.float32)
    out = jax.block_until_ready(neural_network_forward(x, prep))
    ref = reference_forward(x, params)
    assert out.shape == (8, num_out)
    assert jnp.allclose(out, ref, atol=1e-5, rtol=1e-5), "mismatch vs reference (B=8)"

    # 2) Multi-step grid with a partial edge block (B % TB != 0, B % 8 != 0):
    #    exercises the 2-step "parallel" grid and Pallas edge-block masking.
    x2 = jax.random.normal(kx2, (37, num_in), jnp.float32)
    out2 = jax.block_until_ready(neural_network_forward(x2, prep))
    ref2 = reference_forward(x2, params)
    assert out2.shape == (37, num_out)
    assert jnp.allclose(out2, ref2, atol=1e-5, rtol=1e-5), "mismatch vs reference (B=37)"

    print("KERNEL_OK")
</pallas_src>

<mosaic_0001>
module attributes {stable_mosaic.version = 11 : i64} {
  func.func @mlp_kernel(%arg0: i32, %arg1: memref<8x4xf32, #tpu.memory_space<vmem>>, %arg2: memref<4x128xf32, #tpu.memory_space<vmem>>, %arg3: memref<1x128xf32, #tpu.memory_space<vmem>>, %arg4: memref<128x128xf32, #tpu.memory_space<vmem>>, %arg5: memref<1x128xf32, #tpu.memory_space<vmem>>, %arg6: memref<128x3xf32, #tpu.memory_space<vmem>>, %arg7: memref<1x3xf32, #tpu.memory_space<vmem>>, %arg8: memref<8x3xf32, #tpu.memory_space<vmem>>) attributes {dimension_semantics = [#tpu.dimension_semantics<parallel>], iteration_bounds = array<i64: 1>, scalar_prefetch = 0 : i64, scratch_operands = 0 : i64, tpu.core_type = #tpu.core_type<tc>, window_params = [{transform_indices = @transform_0, window_bounds = array<i64: 8, 4>}, {pipeline_mode = #tpu.pipeline_mode<synchronous>, transform_indices = @transform_1, window_bounds = array<i64: 4, 128>}, {pipeline_mode = #tpu.pipeline_mode<synchronous>, transform_indices = @transform_2, window_bounds = array<i64: 1, 128>}, {pipeline_mode = #tpu.pipeline_mode<synchronous>, transform_indices = @transform_3, window_bounds = array<i64: 128, 128>}, {pipeline_mode = #tpu.pipeline_mode<synchronous>, transform_indices = @transform_4, window_bounds = array<i64: 1, 128>}, {pipeline_mode = #tpu.pipeline_mode<synchronous>, transform_indices = @transform_5, window_bounds = array<i64: 128, 3>}, {pipeline_mode = #tpu.pipeline_mode<synchronous>, transform_indices = @transform_6, window_bounds = array<i64: 1, 3>}, {transform_indices = @transform_7, window_bounds = array<i64: 8, 3>}]} {
    %c0 = arith.constant 0 : index
    %c0_0 = arith.constant 0 : index
    %0 = vector.load %arg1[%c0, %c0_0] : memref<8x4xf32, #tpu.memory_space<vmem>>, vector<8x4xf32>
    %c0_1 = arith.constant 0 : index
    %c0_2 = arith.constant 0 : index
    %1 = vector.load %arg2[%c0_1, %c0_2] : memref<4x128xf32, #tpu.memory_space<vmem>>, vector<4x128xf32>
    %cst = arith.constant dense<0.000000e+00> : vector<8x128xf32>
    %2 = tpu.matmul %0, %1, %cst {dimension_numbers = #tpu.dot_dimension_numbers<[1], [0], [0], [1], [0, 0, 1, 1], [], []>} : vector<8x4xf32>, vector<4x128xf32>, vector<8x128xf32> -> vector<8x128xf32>
    %c0_3 = arith.constant 0 : index
    %c0_4 = arith.constant 0 : index
    %3 = vector.load %arg3[%c0_3, %c0_4] : memref<1x128xf32, #tpu.memory_space<vmem>>, vector<1x128xf32>
    %4 = vector.broadcast %3 : vector<1x128xf32> to vector<8x128xf32>
    %5 = arith.addf %2, %4 : vector<8x128xf32>
    %cst_5 = arith.constant 0.000000e+00 : f32
    %6 = vector.broadcast %cst_5 : f32 to vector<8x128xf32>
    %7 = arith.maximumf %5, %6 : vector<8x128xf32>
    %c0_6 = arith.constant 0 : index
    %c0_7 = arith.constant 0 : index
    %8 = vector.load %arg4[%c0_6, %c0_7] : memref<128x128xf32, #tpu.memory_space<vmem>>, vector<128x128xf32>
    %cst_8 = arith.constant dense<0.000000e+00> : vector<8x128xf32>
    %9 = tpu.matmul %7, %8, %cst_8 {dimension_numbers = #tpu.dot_dimension_numbers<[1], [0], [0], [1], [0, 0, 1, 1], [], []>} : vector<8x128xf32>, vector<128x128xf32>, vector<8x128xf32> -> vector<8x128xf32>
    %c0_9 = arith.constant 0 : index
    %c0_10 = arith.constant 0 : index
    %10 = vector.load %arg5[%c0_9, %c0_10] : memref<1x128xf32, #tpu.memory_space<vmem>>, vector<1x128xf32>
    %11 = vector.broadcast %10 : vector<1x128xf32> to vector<8x128xf32>
    %12 = arith.addf %9, %11 : vector<8x128xf32>
    %cst_11 = arith.constant 0.000000e+00 : f32
    %13 = vector.broadcast %cst_11 : f32 to vector<8x128xf32>
    %14 = arith.maximumf %12, %13 : vector<8x128xf32>
    %c0_12 = arith.constant 0 : index
    %c0_13 = arith.constant 0 : index
    %15 = vector.load %arg6[%c0_12, %c0_13] : memref<128x3xf32, #tpu.memory_space<vmem>>, vector<128x3xf32>
    %cst_14 = arith.constant dense<0.000000e+00> : vector<8x3xf32>
    %16 = tpu.matmul %14, %15, %cst_14 {dimension_numbers = #tpu.dot_dimension_numbers<[1], [0], [0], [1], [0, 0, 1, 1], [], []>} : vector<8x128xf32>, vector<128x3xf32>, vector<8x3xf32> -> vector<8x3xf32>
    %c0_15 = arith.constant 0 : index
    %c0_16 = arith.constant 0 : index
    %17 = vector.load %arg7[%c0_15, %c0_16] : memref<1x3xf32, #tpu.memory_space<vmem>>, vector<1x3xf32>
    %18 = vector.broadcast %17 : vector<1x3xf32> to vector<8x3xf32>
    %19 = arith.addf %16, %18 : vector<8x3xf32>
    %c0_17 = arith.constant 0 : index
    %c0_18 = arith.constant 0 : index
    %20 = vector.load %arg8[%c0_17, %c0_18] : memref<8x3xf32, #tpu.memory_space<vmem>>, vector<8x3xf32>
    tpu.vector_store %arg8[%c0_17, %c0_18], %19 {strides = array<i32>} : memref<8x3xf32, #tpu.memory_space<vmem>>, vector<8x3xf32>,
    return
  }
  func.func @transform_0(%arg0: i32) -> (i32, i32) {
    %c0_i32 = arith.constant 0 : i32
    %c0_i32_0 = arith.constant 0 : i32
    return %arg0, %c0_i32 : i32, i32
  }
  func.func @transform_1(%arg0: i32) -> (i32, i32) {
    %c0_i32 = arith.constant 0 : i32
    %c0_i32_0 = arith.constant 0 : i32
    %c0_i32_1 = arith.constant 0 : i32
    return %c0_i32, %c0_i32_0 : i32, i32
  }
  func.func @transform_2(%arg0: i32) -> (i32, i32) {
    %c0_i32 = arith.constant 0 : i32
    %c0_i32_0 = arith.constant 0 : i32
    %c0_i32_1 = arith.constant 0 : i32
    return %c0_i32, %c0_i32_0 : i32, i32
  }
  func.func @transform_3(%arg0: i32) -> (i32, i32) {
    %c0_i32 = arith.constant 0 : i32
    %c0_i32_0 = arith.constant 0 : i32
    %c0_i32_1 = arith.constant 0 : i32
    return %c0_i32, %c0_i32_0 : i32, i32
  }
  func.func @transform_4(%arg0: i32) -> (i32, i32) {
    %c0_i32 = arith.constant 0 : i32
    %c0_i32_0 = arith.constant 0 : i32
    %c0_i32_1 = arith.constant 0 : i32
    return %c0_i32, %c0_i32_0 : i32, i32
  }
  func.func @transform_5(%arg0: i32) -> (i32, i32) {
    %c0_i32 = arith.constant 0 : i32
    %c0_i32_0 = arith.constant 0 : i32
    %c0_i32_1 = arith.constant 0 : i32
    return %c0_i32, %c0_i32_0 : i32, i32
  }
  func.func @transform_6(%arg0: i32) -> (i32, i32) {
    %c0_i32 = arith.constant 0 : i32
    %c0_i32_0 = arith.constant 0 : i32
    %c0_i32_1 = arith.constant 0 : i32
    return %c0_i32, %c0_i32_0 : i32, i32
  }
  func.func @transform_7(%arg0: i32) -> (i32, i32) {
    %c0_i32 = arith.constant 0 : i32
    %c0_i32_0 = arith.constant 0 : i32
    return %arg0, %c0_i32 : i32, i32
  }
}

</mosaic_0001>

<bundles_post_ra>
// kernel: tpu_custom_call.1
= control target key start
LH: loop header
LB: loop body
LE: loop exit
PB: predicated region body
PF: predicated region fallthrough
CT: control target
= control target key end

     0   :  { %vm39_vm0 = vcmask 1043456   ;;  %vm35_vm1 = vcmask 31744   ;;  %v425_v0 = vmov 0.0   ;;  %vm426_vm2 = vmmov 0   ;;  %s620_s1 = inlined_call_operand.vmem [shape: f32[4,128], index: 1, kind: input, shape index: {}]   ;;  %s621_s0 = inlined_call_operand.vmem [shape: f32[8,4], index: 0, kind: input, shape index: {}]   ;;  %s622_s3 = inlined_call_operand.vmem [shape: f32[128,128], index: 3, kind: input, shape index: {}]   ;;  %s623_s5 = inlined_call_operand.vmem [shape: f32[128,3], index: 5, kind: input, shape index: {}]   ;;  %s624_s2 = inlined_call_operand.vmem [shape: f32[1,128], index: 2, kind: input, shape index: {}]   ;;  %s625_s4 = inlined_call_operand.vmem [shape: f32[1,128], index: 4, kind: input, shape index: {}]   ;;  %s626_s6 = inlined_call_operand.vmem [shape: f32[1,3], index: 6, kind: input, shape index: {}]   ;;  %s627_s7 = inlined_call_operand.vmem [shape: f32[8,3], index: 7, kind: output, shape index: {}]  }
   0x1   :  { %348 = vmatprep.subr.mxu0 %v425_v0  ;;  %v27_v1 = vld [vmem:[%s620_s1] sm:$0xf]  ;;  %350 = vmatprep.mubr.msk.f32.mxu0 %vm426_vm2, %v425_v0  ;;  %v129_v3 = vld [vmem:[%s622_s3 + $0x78] sm:$0xff]  ;;  %v128_v4 = vld [vmem:[%s622_s3 + $0x70] sm:$0xff]  ;;  %vm301_vm3 = vcmask 23552  }
   0x2   :  { %v26_v2 = vld [vmem:[%s621_s0] sm:$0xff]  ;;  %349 = vmatpush3.msk.msra.mxu0 %vm39_vm0, %v27_v1  ;;  %353 = vmatprep.subr.mxu1 %v425_v0  ;;  %v127_v5 = vld [vmem:[%s622_s3 + $0x68] sm:$0xff]  ;;  %v125_v7 = vld [vmem:[%s622_s3 + $0x58] sm:$0xff] }
   0x3   :  { %351 = vmatmul.mubr.msk.f32.vlgmr.msra.gmra.mxu0 %vm35_vm1, %v26_v2  ;;  %354 = vmatpush3.msra.mxu1 %v129_v3  ;;  %v126_v6 = vld [vmem:[%s622_s3 + $0x60] sm:$0xff]  ;;  %v124_v8 = vld [vmem:[%s622_s3 + $0x50] sm:$0xff]  ;;  %v123_v9 = vld [vmem:[%s622_s3 + $0x48] sm:$0xff] }
   0x4   :  { %355 = vmatprep.subr.mxu1 %v425_v0  ;;  %385 = vmatprep.mubr.msk.f32.mxu1 %vm426_vm2, %v425_v0  ;;  %v122_v10 = vld [vmem:[%s622_s3 + $0x40] sm:$0xff]  ;;  %v121_v11 = vld [vmem:[%s622_s3 + $0x38] sm:$0xff]  ;;  %v120_v12 = vld [vmem:[%s622_s3 + $0x30] sm:$0xff] }
   0x5   :  { %356 = vmatpush3.msra.mxu1 %v128_v4  ;;  %388 = vmatprep.subr.mxu0 %v425_v0  ;;  %v119_v13 = vld [vmem:[%s622_s3 + $0x28] sm:$0xff]  ;;  %v118_v14 = vld [vmem:[%s622_s3 + $0x20] sm:$0xff]  ;;  %v117_v15 = vld [vmem:[%s622_s3 + $0x18] sm:$0xff] }
   0x6   :  { %357 = vmatprep.subr.mxu1 %v425_v0  ;;  %420 = vmatprep.mubr.msk.f32.mxu0 %vm426_vm2, %v425_v0  ;;  %v116_v16 = vld [vmem:[%s622_s3 + $0x10] sm:$0xff]  ;;  %v115_v17 = vld [vmem:[%s622_s3 + $0x8] sm:$0xff]  ;;  %v114_v18 = vld [vmem:[%s622_s3] sm:$0xff] }
   0x7   :  { %358 = vmatpush3.msra.mxu1 %v127_v5  ;;  %v223_v19 = vld [vmem:[%s623_s5 + $0x78] sm:$0xff]  ;;  %v222_v20 = vld [vmem:[%s623_s5 + $0x70] sm:$0xff]  ;;  %v221_v21 = vld [vmem:[%s623_s5 + $0x68] sm:$0xff] }
   0x8   :  { %359 = vmatprep.subr.mxu1 %v425_v0  ;;  %389 = vmatpush3.msra.mxu0 %v223_v19  ;;  %v220_v22 = vld [vmem:[%s623_s5 + $0x60] sm:$0xff]  ;;  %v219_v23 = vld [vmem:[%s623_s5 + $0x58] sm:$0xff]  ;;  %v218_v24 = vld [vmem:[%s623_s5 + $0x50] sm:$0xff] }
   0x9   :  { %360 = vmatpush3.msra.mxu1 %v126_v6  ;;  %390 = vmatprep.subr.mxu0 %v425_v0  ;;  %v217_v25 = vld [vmem:[%s623_s5 + $0x48] sm:$0xff]  ;;  %v216_v26 = vld [vmem:[%s623_s5 + $0x40] sm:$0xff]  ;;  %v215_v27 = vld [vmem:[%s623_s5 + $0x38] sm:$0xff] }
   0xa   :  { %361 = vmatprep.subr.mxu1 %v425_v0  ;;  %391 = vmatpush3.msra.mxu0 %v222_v20  ;;  %v214_v28 = vld [vmem:[%s623_s5 + $0x30] sm:$0xff]  ;;  %v213_v29 = vld [vmem:[%s623_s5 + $0x28] sm:$0xff]  ;;  %v212_v30 = vld [vmem:[%s623_s5 + $0x20] sm:$0xff] }
   0xb   :  { %362 = vmatpush3.msra.mxu1 %v125_v7  ;;  %392 = vmatprep.subr.mxu0 %v425_v0  ;;  %v211_v31 = vld [vmem:[%s623_s5 + $0x18] sm:$0xff]  ;;  %v307_v32 = vld [vmem:[%s624_s2] ss:$0 sm:$0xff]  ;;  %v210_v37 = vld [vmem:[%s623_s5 + $0x10] sm:$0xff] }
   0xc   :  { %363 = vmatprep.subr.mxu1 %v425_v0  ;;  %393 = vmatpush3.msra.mxu0 %v221_v21  ;;  %v209_v38 = vld [vmem:[%s623_s5 + $0x8] sm:$0xff]  ;;  %v208_v39 = vld [vmem:[%s623_s5] sm:$0xff] }
   0xd   :  { %364 = vmatpush3.msra.mxu1 %v124_v8  ;;  %394 = vmatprep.subr.mxu0 %v425_v0  ;;  %v310_v40 = vld [vmem:[%s625_s4] ss:$0 sm:$0xff] }
   0xe   :  { %365 = vmatprep.subr.mxu1 %v425_v0  ;;  %395 = vmatpush3.msra.mxu0 %v220_v22  ;;  %v311_v45 = vld [vmem:[%s626_s6] ss:$0 sm:$0xff] }
   0xf   :  { %366 = vmatpush3.msra.mxu1 %v123_v9  ;;  %396 = vmatprep.subr.mxu0 %v425_v0 }
  0x10   :  { %367 = vmatprep.subr.mxu1 %v425_v0  ;;  %397 = vmatpush3.msra.mxu0 %v219_v23 }
  0x11   :  { %368 = vmatpush3.msra.mxu1 %v122_v10  ;;  %398 = vmatprep.subr.mxu0 %v425_v0 }
  0x12   :  { %369 = vmatprep.subr.mxu1 %v425_v0  ;;  %399 = vmatpush3.msra.mxu0 %v218_v24 }
  0x13   :  { %370 = vmatpush3.msra.mxu1 %v121_v11  ;;  %400 = vmatprep.subr.mxu0 %v425_v0 }
  0x14   :  { %371 = vmatprep.subr.mxu1 %v425_v0  ;;  %401 = vmatpush3.msra.mxu0 %v217_v25 }
  0x15   :  { %372 = vmatpush3.msra.mxu1 %v120_v12  ;;  %402 = vmatprep.subr.mxu0 %v425_v0 }
  0x16   :  { %373 = vmatprep.subr.mxu1 %v425_v0  ;;  %403 = vmatpush3.msra.mxu0 %v216_v26 }
  0x17   :  { %374 = vmatpush3.msra.mxu1 %v119_v13  ;;  %404 = vmatprep.subr.mxu0 %v425_v0 }
  0x18   :  { %375 = vmatprep.subr.mxu1 %v425_v0  ;;  %405 = vmatpush3.msra.mxu0 %v215_v27 }
  0x19   :  { %376 = vmatpush3.msra.mxu1 %v118_v14  ;;  %406 = vmatprep.subr.mxu0 %v425_v0 }
  0x1a   :  { %377 = vmatprep.subr.mxu1 %v425_v0  ;;  %407 = vmatpush3.msra.mxu0 %v214_v28 }
  0x1b   :  { %378 = vmatpush3.msra.mxu1 %v117_v15  ;;  %408 = vmatprep.subr.mxu0 %v425_v0 }
  0x1c   :  { %379 = vmatprep.subr.mxu1 %v425_v0  ;;  %409 = vmatpush3.msra.mxu0 %v213_v29 }
  0x1d   :  { %380 = vmatpush3.msra.mxu1 %v116_v16  ;;  %410 = vmatprep.subr.mxu0 %v425_v0 }
  0x1e   :  { %381 = vmatprep.subr.mxu1 %v425_v0  ;;  %411 = vmatpush3.msra.mxu0 %v212_v30 }
  0x1f   :  { %382 = vmatpush3.msra.mxu1 %v115_v17  ;;  %412 = vmatprep.subr.mxu0 %v425_v0 }
  0x20   :  { %383 = vmatprep.subr.mxu1 %v425_v0  ;;  %413 = vmatpush3.msra.mxu0 %v211_v31 }
  0x21   :  { %384 = vmatpush3.msra.mxu1 %v114_v18  ;;  %414 = vmatprep.subr.mxu0 %v425_v0 }
  0x22   :  { %415 = vmatpush3.msra.mxu0 %v210_v37 }
  0x23   :  { %416 = vmatprep.subr.mxu0 %v425_v0 }
  0x24   :  { %417 = vmatpush3.msra.mxu0 %v209_v38 }
  0x25   :  { %418 = vmatprep.subr.mxu0 %v425_v0 }
  0x26   :  { %419 = vmatpush3.msra.mxu0 %v208_v39 }
  0xc3   :  { %v109_v33 = vpop.f32.mrf.mxu0 }
  0xc4   :  { %v110_v34 = vadd.f32 %v307_v32, %v109_v33 }
  0xc5   :  { %v352_v35 = vpop.f32.mrf.mxu0 }
  0xc6   :  { %v113_v36 = vmax.f32 %v110_v34, 0.0 }
  0xc8   :  { %386 = vmatmul.mubr.f32.vlgmr.msra.gmra.mxu1 %v113_v36 }
 0x188   :  { %v203_v41 = vpop.f32.mrf.mxu1 }
 0x189   :  { %v204_v42 = vadd.f32 %v310_v40, %v203_v41 }
 0x18a   :  { %v387_v43 = vpop.f32.mrf.mxu1 }
 0x18b   :  { %v207_v44 = vmax.f32 %v204_v42, 0.0 }
 0x18d   :  { %421 = vmatmul.mubr.f32.vlgmr.msra.gmra.mxu0 %v207_v44 }
 0x24d   :  { %v297_v46 = vpop.f32.mrf.mxu0 }
 0x24e   :  { %v298_v47 = vadd.f32 %v311_v45, %v297_v46 }
 0x24f   :  { %v422_v48 = vpop.f32.mrf.mxu0 }
 0x250   :  { %302 = vst.msk [vmem:[%s627_s7] sm:$0xff] %vm301_vm3, %v298_v47 }

</bundles_post_ra>
